<compile_context>
chip_gen: v7x
topology: tpu7x:2x2x1
jax: 0.10.0
libtpu: 0.0.40
codegen_flags: <defaults>
</compile_context>

<pallas_src>
import functools
import math

import jax
import jax.numpy as jnp
from jax.experimental import pallas as pl
from jax.experimental.pallas import tpu as pltpu


def _round_up(n, m):
    return ((n + m - 1) // m) * m


def _vmem_capacity_bytes():
    """Physical per-core VMEM; fall back to 128 MiB (v5e/v6e) if unqueryable."""
    try:
        cap = getattr(pltpu.get_tpu_info(), "vmem_capacity_bytes", None)
        if cap:
            return int(cap)
    except Exception:
        pass
    return 128 * 1024 * 1024


# ----------------------------------------------------------------------------
# Kernel
# ----------------------------------------------------------------------------
def _mlp_kernel(x_ref, g_ref, beta_ref, w1_ref, b1_ref, w2_ref, b2_ref, o_ref,
                *scratch, eps, residual, compute_dtype, acc_in_out):
    xn_ref = scratch[0]
    # Accumulate directly into the (VMEM-resident) output block when it is f32;
    # otherwise use a dedicated f32 scratch and cast only at the last k step.
    acc_ref = o_ref if acc_in_out else scratch[1]

    k = pl.program_id(1)
    nk = pl.num_programs(1)

    # ---- k == 0: LayerNorm once per row tile, zero the accumulator ----
    @pl.when(k == 0)
    def _():
        x = x_ref[...].astype(jnp.float32)                     # (tm, dim)
        mu = jnp.mean(x, axis=-1, keepdims=True)
        xc = x - mu
        var = jnp.mean(xc * xc, axis=-1, keepdims=True)
        xn = xc * jax.lax.rsqrt(var + eps)
        xn = xn * g_ref[...] + beta_ref[...]                   # affine (1, dim)
        xn_ref[...] = xn.astype(xn_ref.dtype)                  # cached for all k
        acc_ref[...] = jnp.zeros_like(acc_ref)

    # ---- Linear1: (tm, dim) x (dim, th) on MXU, bf16 in / f32 acc ----
    h = jnp.dot(xn_ref[...], w1_ref[...],
                preferred_element_type=jnp.float32) + b1_ref[...]

    # ---- exact GELU (erf form, matches torch.nn.GELU default), f32 ----
    h = 0.5 * h * (1.0 + jax.lax.erf(h * (1.0 / math.sqrt(2.0))))

    # ---- Linear2: (tm, th) x (th, out_dim), accumulate over k ----
    acc_ref[...] += jnp.dot(h.astype(compute_dtype), w2_ref[...],
                            preferred_element_type=jnp.float32
                            ).astype(acc_ref.dtype)

    # ---- last k: bias2 + residual + cast + store ----
    @pl.when(k == nk - 1)
    def _():
        y = acc_ref[...].astype(jnp.float32) + b2_ref[...]
        if residual:
            y = y + x_ref[...].astype(jnp.float32)
        o_ref[...] = y.astype(o_ref.dtype)


# ----------------------------------------------------------------------------
# One-time parameter preparation (cast to bf16, pad hidden, pick hidden tile)
# ----------------------------------------------------------------------------
def prepare_mlp_params(params, *, residual=True, th=512,
                       compute_dtype=jnp.bfloat16,
                       weight_resident_limit_bytes=None):
    gamma, beta = params["ln_gamma"], params["ln_beta"]        # (dim,)
    w1, b1 = params["w1"], params["b1"]                        # (dim, hidden), (hidden,)
    w2, b2 = params["w2"], params["b2"]                        # (hidden, out_dim), (out_dim,)
    dim, hidden = w1.shape
    out_dim = w2.shape[1]
    # The torch module forces residual=False whenever out_dim != dim.
    residual = bool(residual) and (out_dim == dim)

    cap = _vmem_capacity_bytes()
    if weight_resident_limit_bytes is None:
        weight_resident_limit_bytes = int(0.3 * cap)

    # Double-buffered bf16 W1+W2 footprint if kept whole (nk == 1).
    weight_db_bytes = 2 * 2 * (dim * hidden + hidden * out_dim)
    if weight_db_bytes <= weight_resident_limit_bytes:
        th_eff = hidden                                        # nk == 1: weights DMA'd once
    else:
        th_eff = min(th, hidden)
        th_eff = max(128, (th_eff // 128) * 128)               # lane-aligned weight tiles
    hidden_p = _round_up(hidden, th_eff)
    nk = hidden_p // th_eff

    # Cast once outside the per-call path; zero-pad hidden (padded units give
    # GELU(0 + 0) = 0 and multiply zero W2 rows -> contribute nothing).
    w1c = w1.astype(compute_dtype)
    w2c = w2.astype(compute_dtype)
    b1c = b1.astype(jnp.float32)
    if hidden_p != hidden:
        w1c = jnp.pad(w1c, ((0, 0), (0, hidden_p - hidden)))
        w2c = jnp.pad(w2c, ((0, hidden_p - hidden), (0, 0)))
        b1c = jnp.pad(b1c, ((0, hidden_p - hidden),))

    return {
        "gamma": gamma.reshape(1, dim).astype(jnp.float32),
        "beta": beta.reshape(1, dim).astype(jnp.float32),
        "w1": w1c, "b1": b1c.reshape(1, hidden_p),
        "w2": w2c, "b2": b2.reshape(1, out_dim).astype(jnp.float32),
        "dim": dim, "hidden": hidden, "hidden_p": hidden_p, "out_dim": out_dim,
        "th_eff": th_eff, "nk": nk, "residual": residual,
        "compute_dtype": compute_dtype,
    }


# ----------------------------------------------------------------------------
# Forward call
# ----------------------------------------------------------------------------
def mlp_pallas(x, prep, *, eps=1e-5, tm=1024):
    """x: (batch, seq, dim). prep: output of prepare_mlp_params."""
    B, S, dim = x.shape
    assert dim == prep["dim"]
    out_dim, hidden_p = prep["out_dim"], prep["hidden_p"]
    th_eff, nk = prep["th_eff"], prep["nk"]
    residual = prep["residual"]
    compute_dtype = prep["compute_dtype"]

    N = B * S
    x2 = x.reshape(N, dim)
    act_bytes = x2.dtype.itemsize
    out_dtype = x.dtype
    out_bytes = jnp.dtype(out_dtype).itemsize
    acc_in_out = (out_dtype == jnp.float32)      # accumulate straight into o_ref

    cap = _vmem_capacity_bytes()
    budget = int(0.6 * cap)                      # leave room for compiler temps

    def resident_bytes(t):
        return (2 * t * dim * act_bytes                      # x blocks (x2 buffers)
                + 2 * t * out_dim * out_bytes                # out blocks
                + t * dim * 2                                # xn scratch (bf16)
                + (0 if acc_in_out else t * out_dim * 4)     # f32 acc scratch
                + t * th_eff * 4                             # h intermediate (f32)
                + 2 * dim * th_eff * 2                       # W1 blocks (bf16)
                + 2 * th_eff * out_dim * 2                   # W2 blocks (bf16)
                + 2 * th_eff * 4 + 2 * out_dim * 4 + 4 * dim * 4)  # biases / LN

    # Row tile: largest candidate that fits the VMEM budget, not (much) larger
    # than the padded row count, and giving >= 2 tiles when rows are plentiful
    # (v7x megacore load balance).
    n8 = _round_up(N, 8)
    tm_eff = 8
    for cand in (1024, 768, 512, 384, 256, 128, 64, 32, 16, 8):
        if cand > tm or cand > n8:
            continue
        if resident_bytes(cand) > budget:
            continue
        if N > 256 and _round_up(N, cand) // cand < 2:
            continue
        tm_eff = cand
        break

    Np = _round_up(N, tm_eff)
    if Np != N:
        x2 = jnp.pad(x2, ((0, Np - N), (0, 0)))
    n_row_tiles = Np // tm_eff

    vmem_limit = int(min(resident_bytes(tm_eff) + (16 << 20), int(0.85 * cap)))
    vmem_limit = max(vmem_limit, 32 << 20)

    # Advisory cost: weights are re-streamed once per row tile when nk > 1.
    weight_bytes = prep["w1"].size * 2 + prep["w2"].size * 2
    weight_stream = weight_bytes * (1 if nk == 1 else n_row_tiles)
    flops = 2 * Np * dim * hidden_p + 2 * Np * hidden_p * out_dim
    bytes_accessed = (Np * dim * act_bytes + Np * out_dim * out_bytes
                      + weight_stream + (hidden_p + out_dim + 2 * dim) * 4)
    cost = pl.CostEstimate(flops=flops, transcendentals=Np * hidden_p,
                           bytes_accessed=bytes_accessed)

    scratch_shapes = [pltpu.VMEM((tm_eff, dim), compute_dtype)]   # cached LN(x)
    if not acc_in_out:
        scratch_shapes.append(pltpu.VMEM((tm_eff, out_dim), jnp.float32))

    kernel = functools.partial(_mlp_kernel, eps=eps, residual=residual,
                               compute_dtype=compute_dtype, acc_in_out=acc_in_out)

    out2 = pl.pallas_call(
        kernel,
        out_shape=jax.ShapeDtypeStruct((Np, out_dim), out_dtype),
        grid_spec=pltpu.PrefetchScalarGridSpec(
            num_scalar_prefetch=0,
            grid=(n_row_tiles, nk),                                    # rows, hidden-reduction
            in_specs=[
                pl.BlockSpec((tm_eff, dim), lambda i, k: (i, 0)),      # x rows (resident over k)
                pl.BlockSpec((1, dim), lambda i, k: (0, 0)),           # LN gamma
                pl.BlockSpec((1, dim), lambda i, k: (0, 0)),           # LN beta
                pl.BlockSpec((dim, th_eff), lambda i, k: (0, k)),      # W1 column tile
                pl.BlockSpec((1, th_eff), lambda i, k: (0, k)),        # b1 tile
                pl.BlockSpec((th_eff, out_dim), lambda i, k: (k, 0)),  # W2 row tile
                pl.BlockSpec((1, out_dim), lambda i, k: (0, 0)),       # b2
            ],
            out_specs=pl.BlockSpec((tm_eff, out_dim), lambda i, k: (i, 0)),
            scratch_shapes=scratch_shapes,
        ),
        compiler_params=pltpu.CompilerParams(
            dimension_semantics=("parallel", "arbitrary"),
            vmem_limit_bytes=vmem_limit),
        cost_estimate=cost,
    )(x2, prep["gamma"], prep["beta"], prep["w1"], prep["b1"],
      prep["w2"], prep["b2"])

    return out2[:N].reshape(B, S, out_dim)


# ----------------------------------------------------------------------------
# Init / reference
# ----------------------------------------------------------------------------
def init_params(key, dim, hidden_dim, out_dim=None):
    """Deterministic init mirroring torch defaults (LN ones/zeros, Linear U(+-1/sqrt(fan_in)))."""
    if out_dim is None:
        out_dim = dim
    k1, k2, k3, k4 = jax.random.split(key, 4)
    bound1 = 1.0 / math.sqrt(dim)
    bound2 = 1.0 / math.sqrt(hidden_dim)
    return {
        "ln_gamma": jnp.ones((dim,), jnp.float32),
        "ln_beta": jnp.zeros((dim,), jnp.float32),
        "w1": jax.random.uniform(k1, (dim, hidden_dim), jnp.float32, -bound1, bound1),
        "b1": jax.random.uniform(k2, (hidden_dim,), jnp.float32, -bound1, bound1),
        "w2": jax.random.uniform(k3, (hidden_dim, out_dim), jnp.float32, -bound2, bound2),
        "b2": jax.random.uniform(k4, (out_dim,), jnp.float32, -bound2, bound2),
    }


def mlp_reference(x, params, *, eps=1e-5, residual=True):
    """Pure-JAX f32 reference for correctness checking."""
    mu = jnp.mean(x, axis=-1, keepdims=True)
    var = jnp.mean((x - mu) ** 2, axis=-1, keepdims=True)
    xn = (x - mu) / jnp.sqrt(var + eps) * params["ln_gamma"] + params["ln_beta"]
    h = xn @ params["w1"] + params["b1"]
    h = 0.5 * h * (1.0 + jax.lax.erf(h / math.sqrt(2.0)))
    y = h @ params["w2"] + params["b2"]
    if residual and y.shape[-1] == x.shape[-1]:
        return x + y
    return y


if __name__ == "__main__":
    key = jax.random.PRNGKey(0)
    kx, kp, kx2, kp2, kx3, kp3 = jax.random.split(key, 6)

    # --- 1) small residual MLP (dim == out_dim): weights fully VMEM-resident (nk=1) ---
    batch, seq, dim, hidden = 2, 8, 32, 64
    x = jax.random.normal(kx, (batch, seq, dim), jnp.float32)
    params = init_params(kp, dim, hidden)
    prep = prepare_mlp_params(params, residual=True)
    out = jax.block_until_ready(mlp_pallas(x, prep))
    ref = mlp_reference(x, params, residual=True)
    assert out.shape == (batch, seq, dim)
    # bf16 matmul inputs with f32 accumulation -> looser tolerance vs f32 ref.
    assert jnp.allclose(out, ref, atol=5e-2, rtol=5e-2), "mismatch vs reference (small)"

    # --- 2) non-aligned rows + non-divisible hidden, forced k-reduction path ---
    batch2, seq2, dim2, hidden2 = 3, 50, 256, 1152
    x2 = jax.random.normal(kx2, (batch2, seq2, dim2), jnp.float32)
    params2 = init_params(kp2, dim2, hidden2)
    prep2 = prepare_mlp_params(params2, residual=True, th=512,
                               weight_resident_limit_bytes=0)   # force nk > 1 (tests hidden padding)
    out2 = jax.block_until_ready(mlp_pallas(x2, prep2))
    ref2 = mlp_reference(x2, params2, residual=True)
    assert out2.shape == (batch2, seq2, dim2)
    assert jnp.allclose(out2, ref2, atol=5e-2, rtol=5e-2), "mismatch vs reference (tiled)"

    # --- 3) out_dim != dim -> residual auto-disabled (matches the torch module) ---
    batch3, seq3, dim3, hidden3, out_dim3 = 2, 8, 64, 128, 96
    x3 = jax.random.normal(kx3, (batch3, seq3, dim3), jnp.float32)
    params3 = init_params(kp3, dim3, hidden3, out_dim=out_dim3)
    prep3 = prepare_mlp_params(params3, residual=True)
    out3 = jax.block_until_ready(mlp_pallas(x3, prep3))
    ref3 = mlp_reference(x3, params3, residual=True)
    assert out3.shape == (batch3, seq3, out_dim3)
    assert jnp.allclose(out3, ref3, atol=5e-2, rtol=5e-2), "mismatch vs reference (proj)"

    print("KERNEL_OK")
</pallas_src>

<mosaic_0001>
module attributes {stable_mosaic.version = 11 : i64} {
  func.func @_mlp_kernel(%arg0: i32, %arg1: i32, %arg2: memref<16x32xf32, #tpu.memory_space<vmem>>, %arg3: memref<1x32xf32, #tpu.memory_space<vmem>>, %arg4: memref<1x32xf32, #tpu.memory_space<vmem>>, %arg5: memref<32x64xbf16, #tpu.memory_space<vmem>>, %arg6: memref<1x64xf32, #tpu.memory_space<vmem>>, %arg7: memref<64x32xbf16, #tpu.memory_space<vmem>>, %arg8: memref<1x32xf32, #tpu.memory_space<vmem>>, %arg9: memref<16x32xf32, #tpu.memory_space<vmem>>, %arg10: memref<16x32xbf16, #tpu.memory_space<vmem>>) attributes {dimension_semantics = [#tpu.dimension_semantics<parallel>, #tpu.dimension_semantics<arbitrary>], iteration_bounds = array<i64: 1, 1>, scalar_prefetch = 0 : i64, scratch_operands = 1 : i64, tpu.core_type = #tpu.core_type<tc>, window_params = [{transform_indices = @transform_0, window_bounds = array<i64: 16, 32>}, {pipeline_mode = #tpu.pipeline_mode<synchronous>, transform_indices = @transform_1, window_bounds = array<i64: 1, 32>}, {pipeline_mode = #tpu.pipeline_mode<synchronous>, transform_indices = @transform_2, window_bounds = array<i64: 1, 32>}, {transform_indices = @transform_3, window_bounds = array<i64: 32, 64>}, {transform_indices = @transform_4, window_bounds = array<i64: 1, 64>}, {transform_indices = @transform_5, window_bounds = array<i64: 64, 32>}, {pipeline_mode = #tpu.pipeline_mode<synchronous>, transform_indices = @transform_6, window_bounds = array<i64: 1, 32>}, {transform_indices = @transform_7, window_bounds = array<i64: 16, 32>}]} {
    %c0_i32 = arith.constant 0 : i32
    %0 = arith.cmpi eq, %arg1, %c0_i32 : i32
    %1 = arith.extui %0 : i1 to i32
    %c0_i32_0 = arith.constant 0 : i32
    %2 = arith.cmpi ne, %1, %c0_i32_0 : i32
    scf.if %2 {
      %c0_18 = arith.constant 0 : index
      %c0_19 = arith.constant 0 : index
      %26 = vector.load %arg2[%c0_18, %c0_19] : memref<16x32xf32, #tpu.memory_space<vmem>>, vector<16x32xf32>
      %cst_20 = arith.constant dense<0.000000e+00> : vector<16xf32>
      %27 = vector.multi_reduction <add>, %26, %cst_20 [1] : vector<16x32xf32> to vector<16xf32>
      %28 = vector.shape_cast %27 : vector<16xf32> to vector<16x1xf32>
      %cst_21 = arith.constant 3.200000e+01 : f32
      %29 = vector.broadcast %cst_21 : f32 to vector<16x1xf32>
      %30 = arith.divf %28, %29 : vector<16x1xf32>
      %31 = vector.broadcast %30 : vector<16x1xf32> to vector<16x32xf32>
      %32 = arith.subf %26, %31 : vector<16x32xf32>
      %33 = arith.mulf %32, %32 : vector<16x32xf32>
      %cst_22 = arith.constant dense<0.000000e+00> : vector<16xf32>
      %34 = vector.multi_reduction <add>, %33, %cst_22 [1] : vector<16x32xf32> to vector<16xf32>
      %35 = vector.shape_cast %34 : vector<16xf32> to vector<16x1xf32>
      %cst_23 = arith.constant 3.200000e+01 : f32
      %36 = vector.broadcast %cst_23 : f32 to vector<16x1xf32>
      %37 = arith.divf %35, %36 : vector<16x1xf32>
      %cst_24 = arith.constant 9.99999974E-6 : f32
      %38 = vector.broadcast %cst_24 : f32 to vector<16x1xf32>
      %39 = arith.addf %37, %38 : vector<16x1xf32>
      %40 = math.rsqrt %39 : vector<16x1xf32>
      %41 = vector.broadcast %40 : vector<16x1xf32> to vector<16x32xf32>
      %42 = arith.mulf %32, %41 : vector<16x32xf32>
      %c0_25 = arith.constant 0 : index
      %c0_26 = arith.constant 0 : index
      %43 = vector.load %arg3[%c0_25, %c0_26] : memref<1x32xf32, #tpu.memory_space<vmem>>, vector<1x32xf32>
      %44 = vector.broadcast %43 : vector<1x32xf32> to vector<16x32xf32>
      %45 = arith.mulf %42, %44 : vector<16x32xf32>
      %c0_27 = arith.constant 0 : index
      %c0_28 = arith.constant 0 : index
      %46 = vector.load %arg4[%c0_27, %c0_28] : memref<1x32xf32, #tpu.memory_space<vmem>>, vector<1x32xf32>
      %47 = vector.broadcast %46 : vector<1x32xf32> to vector<16x32xf32>
      %48 = arith.addf %45, %47 : vector<16x32xf32>
      %49 = arith.truncf %48 : vector<16x32xf32> to vector<16x32xbf16>
      %c0_29 = arith.constant 0 : index
      %c0_30 = arith.constant 0 : index
      %50 = vector.load %arg10[%c0_29, %c0_30] : memref<16x32xbf16, #tpu.memory_space<vmem>>, vector<16x32xbf16>
      tpu.vector_store %arg10[%c0_29, %c0_30], %49 {strides = array<i32>} : memref<16x32xbf16, #tpu.memory_space<vmem>>, vector<16x32xbf16>,
      %cst_31 = arith.constant 0.000000e+00 : f32
      %51 = vector.broadcast %cst_31 : f32 to vector<16x32xf32>
      %c0_32 = arith.constant 0 : index
      %c0_33 = arith.constant 0 : index
      %52 = vector.load %arg9[%c0_32, %c0_33] : memref<16x32xf32, #tpu.memory_space<vmem>>, vector<16x32xf32>
      tpu.vector_store %arg9[%c0_32, %c0_33], %51 {strides = array<i32>} : memref<16x32xf32, #tpu.memory_space<vmem>>, vector<16x32xf32>,
    } else {
    }
    %c0 = arith.constant 0 : index
    %c0_1 = arith.constant 0 : index
    %3 = vector.load %arg10[%c0, %c0_1] : memref<16x32xbf16, #tpu.memory_space<vmem>>, vector<16x32xbf16>
    %c0_2 = arith.constant 0 : index
    %c0_3 = arith.constant 0 : index
    %4 = vector.load %arg5[%c0_2, %c0_3] : memref<32x64xbf16, #tpu.memory_space<vmem>>, vector<32x64xbf16>
    %cst = arith.constant dense<0.000000e+00> : vector<16x64xf32>
    %5 = tpu.matmul %3, %4, %cst {dimension_numbers = #tpu.dot_dimension_numbers<[1], [0], [0], [1], [0, 0, 1, 1], [], []>} : vector<16x32xbf16>, vector<32x64xbf16>, vector<16x64xf32> -> vector<16x64xf32>
    %c0_4 = arith.constant 0 : index
    %c0_5 = arith.constant 0 : index
    %6 = vector.load %arg6[%c0_4, %c0_5] : memref<1x64xf32, #tpu.memory_space<vmem>>, vector<1x64xf32>
    %7 = vector.broadcast %6 : vector<1x64xf32> to vector<16x64xf32>
    %8 = arith.addf %5, %7 : vector<16x64xf32>
    %cst_6 = arith.constant 5.000000e-01 : f32
    %9 = vector.broadcast %cst_6 : f32 to vector<16x64xf32>
    %10 = arith.mulf %9, %8 : vector<16x64xf32>
    %cst_7 = arith.constant 0.707106769 : f32
    %11 = vector.broadcast %cst_7 : f32 to vector<16x64xf32>
    %12 = arith.mulf %8, %11 : vector<16x64xf32>
    %13 = math.erf %12 : vector<16x64xf32>
    %cst_8 = arith.constant 1.000000e+00 : f32
    %14 = vector.broadcast %cst_8 : f32 to vector<16x64xf32>
    %15 = arith.addf %14, %13 : vector<16x64xf32>
    %16 = arith.mulf %10, %15 : vector<16x64xf32>
    %c0_9 = arith.constant 0 : index
    %c0_10 = arith.constant 0 : index
    %17 = vector.load %arg9[%c0_9, %c0_10] : memref<16x32xf32, #tpu.memory_space<vmem>>, vector<16x32xf32>
    %18 = arith.truncf %16 : vector<16x64xf32> to vector<16x64xbf16>
    %c0_11 = arith.constant 0 : index
    %c0_12 = arith.constant 0 : index
    %19 = vector.load %arg7[%c0_11, %c0_12] : memref<64x32xbf16, #tpu.memory_space<vmem>>, vector<64x32xbf16>
    %cst_13 = arith.constant dense<0.000000e+00> : vector<16x32xf32>
    %20 = tpu.matmul %18, %19, %cst_13 {dimension_numbers = #tpu.dot_dimension_numbers<[1], [0], [0], [1], [0, 0, 1, 1], [], []>} : vector<16x64xbf16>, vector<64x32xbf16>, vector<16x32xf32> -> vector<16x32xf32>
    %21 = arith.addf %17, %20 : vector<16x32xf32>
    %c0_14 = arith.constant 0 : index
    %c0_15 = arith.constant 0 : index
    %22 = vector.load %arg9[%c0_14, %c0_15] : memref<16x32xf32, #tpu.memory_space<vmem>>, vector<16x32xf32>
    tpu.vector_store %arg9[%c0_14, %c0_15], %21 {strides = array<i32>} : memref<16x32xf32, #tpu.memory_space<vmem>>, vector<16x32xf32>,
    %c0_i32_16 = arith.constant 0 : i32
    %23 = arith.cmpi eq, %arg1, %c0_i32_16 : i32
    %24 = arith.extui %23 : i1 to i32
    %c0_i32_17 = arith.constant 0 : i32
    %25 = arith.cmpi ne, %24, %c0_i32_17 : i32
    scf.if %25 {
      %c0_18 = arith.constant 0 : index
      %c0_19 = arith.constant 0 : index
      %26 = vector.load %arg9[%c0_18, %c0_19] : memref<16x32xf32, #tpu.memory_space<vmem>>, vector<16x32xf32>
      %c0_20 = arith.constant 0 : index
      %c0_21 = arith.constant 0 : index
      %27 = vector.load %arg8[%c0_20, %c0_21] : memref<1x32xf32, #tpu.memory_space<vmem>>, vector<1x32xf32>
      %28 = vector.broadcast %27 : vector<1x32xf32> to vector<16x32xf32>
      %29 = arith.addf %26, %28 : vector<16x32xf32>
      %c0_22 = arith.constant 0 : index
      %c0_23 = arith.constant 0 : index
      %30 = vector.load %arg2[%c0_22, %c0_23] : memref<16x32xf32, #tpu.memory_space<vmem>>, vector<16x32xf32>
      %31 = arith.addf %29, %30 : vector<16x32xf32>
      %c0_24 = arith.constant 0 : index
      %c0_25 = arith.constant 0 : index
      %32 = vector.load %arg9[%c0_24, %c0_25] : memref<16x32xf32, #tpu.memory_space<vmem>>, vector<16x32xf32>
      tpu.vector_store %arg9[%c0_24, %c0_25], %31 {strides = array<i32>} : memref<16x32xf32, #tpu.memory_space<vmem>>, vector<16x32xf32>,
    } else {
    }
    return
  }
  func.func @transform_0(%arg0: i32, %arg1: i32) -> (i32, i32) {
    %c0_i32 = arith.constant 0 : i32
    %c0_i32_0 = arith.constant 0 : i32
    return %arg0, %c0_i32 : i32, i32
  }
  func.func @transform_1(%arg0: i32, %arg1: i32) -> (i32, i32) {
    %c0_i32 = arith.constant 0 : i32
    %c0_i32_0 = arith.constant 0 : i32
    %c0_i32_1 = arith.constant 0 : i32
    return %c0_i32, %c0_i32_0 : i32, i32
  }
  func.func @transform_2(%arg0: i32, %arg1: i32) -> (i32, i32) {
    %c0_i32 = arith.constant 0 : i32
    %c0_i32_0 = arith.constant 0 : i32
    %c0_i32_1 = arith.constant 0 : i32
    return %c0_i32, %c0_i32_0 : i32, i32
  }
  func.func @transform_3(%arg0: i32, %arg1: i32) -> (i32, i32) {
    %c0_i32 = arith.constant 0 : i32
    %c0_i32_0 = arith.constant 0 : i32
    return %c0_i32, %arg1 : i32, i32
  }
  func.func @transform_4(%arg0: i32, %arg1: i32) -> (i32, i32) {
    %c0_i32 = arith.constant 0 : i32
    %c0_i32_0 = arith.constant 0 : i32
    return %c0_i32, %arg1 : i32, i32
  }
  func.func @transform_5(%arg0: i32, %arg1: i32) -> (i32, i32) {
    %c0_i32 = arith.constant 0 : i32
    %c0_i32_0 = arith.constant 0 : i32
    return %arg1, %c0_i32 : i32, i32
  }
  func.func @transform_6(%arg0: i32, %arg1: i32) -> (i32, i32) {
    %c0_i32 = arith.constant 0 : i32
    %c0_i32_0 = arith.constant 0 : i32
    %c0_i32_1 = arith.constant 0 : i32
    return %c0_i32, %c0_i32_0 : i32, i32
  }
  func.func @transform_7(%arg0: i32, %arg1: i32) -> (i32, i32) {
    %c0_i32 = arith.constant 0 : i32
    %c0_i32_0 = arith.constant 0 : i32
    return %arg0, %c0_i32 : i32, i32
  }
}

</mosaic_0001>

<bundles_post_ra>
// kernel: tpu_custom_call.1
= control target key start
LH: loop header
LB: loop body
LE: loop exit
PB: predicated region body
PF: predicated region fallthrough
CT: control target
= control target key end

     0   :  { %vm34_vm0 = vcmask 261120   ;;  %s481_s0 = inlined_call_operand.vmem [shape: f32[16,32], index: 0, kind: input, shape index: {}]   ;;  %s482_s1 = inlined_call_operand.vmem [shape: f32[1,32], index: 1, kind: input, shape index: {}]   ;;  %s483_s2 = inlined_call_operand.vmem [shape: f32[1,32], index: 2, kind: input, shape index: {}]   ;;  %s484_s3 = inlined_call_operand.vmem [shape: bf16[32,64], index: 3, kind: input, shape index: {}]   ;;  %s485_s4 = inlined_call_operand.vmem [shape: f32[1,64], index: 4, kind: input, shape index: {}]   ;;  %s486_s5 = inlined_call_operand.vmem [shape: bf16[64,32], index: 5, kind: input, shape index: {}]   ;;  %s487_s6 = inlined_call_operand.vmem [shape: f32[1,32], index: 6, kind: input, shape index: {}]   ;;  %s488_s7 = inlined_call_operand.hbm [shape: f32[16,32], index: 7, kind: output, shape index: {}]  }
   0x1   :  { %v414_v0 = vld [vmem:[%s481_s0] sm:$0xff]  ;;  %v419_v1 = vld [vmem:[%s481_s0 + $0x8] sm:$0xff] }
   0x2   :  { %v35_v2 = vsel %vm34_vm0, %v414_v0, 0.0  ;;  %v38_v3 = vsel %vm34_vm0, %v419_v1, 0.0 }
   0x3   :  { %36 = vadd.xlane.f32.xlu0 %v35_v2 }
   0x4   :  { %12 = vsyncpa [#allocation4], 0  ;;  %v328_v14 = vld [vmem:[%s484_s3] sm:$0xff]   ;;  %v366_v15 = vmov 0.0   ;;  %v329_v16 = vld [vmem:[%s484_s3 + $0x8] sm:$0xff]   ;;  %vm367_vm1 = vmmov 0  }
   0x5   :  { %303 = vmatprep.subr.bf16.mxu0 %v366_v15  ;;  %82 = vst.msk [vmem:[#allocation3] sm:$0xff] %vm34_vm0, %v366_v15  ;;  %83 = vst.msk [vmem:[#allocation3 + $0x8] sm:$0xff] %vm34_vm0, %v366_v15  ;;  %311 = vmatprep.subr.bf16.mxu1 %v366_v15  ;;  %v283_v25 = vld [vmem:[%s482_s1] ss:$0 sm:$0xff]  ;;  %v331_v36 = vld [vmem:[%s486_s5 + $0x8] sm:$0xff]   ;;  %vm198_vm2 = vcmask 523264  }
   0x6   :  { %304 = vmatpush3.bf16.msra.mxu0 %v328_v14  ;;  %307 = vmatprep.mubr.msk.bf16.mxu0 %vm367_vm1, %v366_v15  ;;  %v284_v29 = vld [vmem:[%s483_s2] ss:$0 sm:$0xff]  ;;  %v332_v37 = vld [vmem:[%s486_s5 + $0x10] sm:$0xff]   ;;  %v333_v38 = vld [vmem:[%s486_s5 + $0x18] sm:$0xff]   ;;  %s368_s19 = smov [#allocation3]  }
   0x7   :  { %39 = vadd.xlane.f32.xlu0 %v38_v3  ;;  %305 = vmatprep.subr.bf16.mxu0 %v366_v15  ;;  %v330_v35 = vld [vmem:[%s486_s5] sm:$0xff]   ;;  %s272_s20 = sshll.u32 %s368_s19, 4  ;;  %s273_s20 = int_to_ptr.vmem [resolvable:$true] %s272_s20 }
   0x8   :  { %319 = vmatprep.mubr.msk.bf16.mxu1 %vm367_vm1, %v366_v15  ;;  %312 = vmatpush3.bf16.msra.mxu1 %v330_v35  ;;  %v285_v39 = vld [vmem:[%s485_s4] ss:$0 sm:$0xff]  ;;  %s342_s21 = scalar_lea.vmem %s273_s20, 256  ;;  %p347_p1 = scmp.lt.s32.totalorder %s273_s20, %s273_s20 }
   0x9   :  { %313 = vmatprep.subr.bf16.mxu1 %v366_v15  ;;  %v294_v3 = vld [vmem:[%s487_s6] ss:$0 sm:$0xff]  ;;  %p343_p0 = scmp.ne.s32.totalorder %s273_s20, %s342_s21  ;;  %p348_p2 = scmp.lt.s32.totalorder %s342_s21, %s342_s21 }
   0xa   :  { %306 = vmatpush3.bf16.msra.mxu0 %v329_v16 }
   0xb   :  { %p349_p3 = por %p348_p2, %p347_p1 }
   0xc   :  { %314 = vmatpush3.bf16.msra.mxu1 %v331_v36  ;;  %v163_v57 = vld [vmem:[#allocation3] sm:$0xff]  ;;  %v164_v59 = vld [vmem:[#allocation3 + $0x8] sm:$0xff] }
   0xd   :  { %315 = vmatprep.subr.bf16.mxu1 %v366_v15  ;;  %p350_p4 = pnand %p349_p3, %p343_p0 }
  0x10   :  { %316 = vmatpush3.bf16.msra.mxu1 %v332_v37 }
  0x11   :  { %317 = vmatprep.subr.bf16.mxu1 %v366_v15 }
  0x14   :  { %318 = vmatpush3.bf16.msra.mxu1 %v333_v38 }
  0x90   :  { %v37_v4 = vpop.xlane.xlu0 %36 }
  0x91   :  { %v42_v5 = vmul.f32 0.03125, %v37_v4 }
  0x93   :  { %v44_v6 = vsub.f32 %v414_v0, %v42_v5 }
  0x94   :  { %v40_v7 = vpop.xlane.xlu0 %39 }
  0x95   :  { %v43_v8 = vmul.f32 0.03125, %v40_v7  ;;  %v46_v9 = vmul.f32 %v44_v6, %v44_v6 }
  0x97   :  { %v45_v10 = vsub.f32 %v419_v1, %v43_v8  ;;  %v48_v11 = vsel %vm34_vm0, %v46_v9, 0.0 }
  0x98   :  { %49 = vadd.xlane.f32.xlu1 %v48_v11 }
  0x99   :  { %v47_v12 = vmul.f32 %v45_v10, %v45_v10 }
  0x9b   :  { %v51_v13 = vsel %vm34_vm0, %v47_v12, 0.0 }
  0x9c   :  { %52 = vadd.xlane.f32.xlu1 %v51_v13 }
 0x125   :  { %v50_v17 = vpop.xlane.xlu1 %49 }
 0x126   :  { %v54_v18 = vmul.f32 0.03125, %v50_v17 }
 0x128   :  { %v56_v19 = vadd.f32 1e-05, %v54_v18 }
 0x129   :  { %v53_v20 = vpop.xlane.xlu1 %52 }
 0x12a   :  { %334 = vrsqrt.f32 %v56_v19  ;;  %v55_v21 = vmul.f32 0.03125, %v53_v20 }
 0x12c   :  { %v57_v22 = vadd.f32 1e-05, %v55_v21 }
 0x12e   :  { %336 = vrsqrt.f32 %v57_v22 }
 0x134   :  { %v335_v23 = vpop.eup %334 }
 0x135   :  { %v60_v24 = vmul.f32 %v335_v23, %v44_v6 }
 0x137   :  { %v69_v27 = vmul.f32 %v283_v25, %v60_v24 }
 0x138   :  { %v337_v26 = vpop.eup %336 }
 0x139   :  { %v61_v28 = vmul.f32 %v337_v26, %v45_v10  ;;  %v78_v31 = vadd.f32 %v284_v29, %v69_v27 }
 0x13b   :  { %v70_v30 = vmul.f32 %v283_v25, %v61_v28 }
 0x13d   :  { %v79_v32 = vadd.f32 %v284_v29, %v70_v30 }
 0x13f   :  { %v80_v33 = vpack.c.bf16 %v79_v32, %v78_v31 }
 0x141   :  { %81 = vst.msk [vmem:[#allocation2] sm:$0xff] %vm34_vm0, %v80_v33 }
 0x148   :  { %v84_v34 = vld [vmem:[#allocation2] sm:$0xff] }
 0x149   :  { %308 = vmatmul.mubr.msk.bf16.vlgmr.msra.gmra.mrb[0].mxu0 %vm34_vm0, %v84_v34 }
 0x21c   :  { %v146_v40 = vpop.f32.mrb[0].mxu0 }
 0x21d   :  { %v147_v41 = vadd.f32 %v285_v39, %v146_v40  ;;  %v309_v42 = vpop.f32.mrb[1].mxu0 }
 0x21e   :  { %v149_v43 = vpop.f32.mrb[2].mxu0 }
 0x21f   :  { %v155_v44 = vmul.f32 0.70710677, %v147_v41  ;;  %v150_v45 = vadd.f32 %v285_v39, %v149_v43  ;;  %v310_v46 = vpop.f32.mrb[3].mxu0  ;;  %v153_v51 = vmul.f32 0.5, %v147_v41 }
 0x221   :  { %338 = verf.f32 %v155_v44  ;;  %v156_v47 = vmul.f32 0.70710677, %v150_v45  ;;  %v154_v52 = vmul.f32 0.5, %v150_v45 }
 0x223   :  { %340 = verf.f32 %v156_v47 }
 0x22b   :  { %v339_v48 = vpop.eup %338 }
 0x22c   :  { %v159_v49 = vadd.f32 1.0, %v339_v48 }
 0x22d   :  { %v341_v50 = vpop.eup %340 }
 0x22e   :  { %v160_v53 = vadd.f32 1.0, %v341_v50  ;;  %v161_v54 = vmul.f32 %v159_v49, %v153_v51 }
 0x230   :  { %v162_v55 = vmul.f32 %v160_v53, %v154_v52 }
 0x232   :  { %v165_v56 = vpack.c.bf16 %v162_v55, %v161_v54 }
 0x234   :  { %320 = vmatmul.mubr.msk.bf16.vlgmr.msra.gmra.mrb[0].mxu1 %vm198_vm2, %v165_v56 }
 0x307   :  { %v236_v58 = vpop.f32.mrb[0].mxu1 }
 0x308   :  { %v243_v60 = vadd.f32 %v236_v58, %v163_v57  ;;  %v321_v61 = vpop.f32.mrb[1].mxu1 }
 0x309   :  { %v239_v62 = vpop.f32.mrb[2].mxu1 }
 0x30a   :  { %245 = vst.msk [vmem:[#allocation3] sm:$0xff] %vm34_vm0, %v243_v60  ;;  %v244_v63 = vadd.f32 %v239_v62, %v164_v59  ;;  %v322_v2 = vpop.f32.mrb[3].mxu1 }
 0x30c   :  { %246 = vst.msk [vmem:[#allocation3 + $0x8] sm:$0xff] %vm34_vm0, %v244_v63 }
 0x311   :  { %v250_v4 = vld [vmem:[#allocation3] sm:$0xff] }
 0x312   :  { %v259_v5 = vadd.f32 %v294_v3, %v250_v4 }
 0x313   :  { %v251_v6 = vld [vmem:[#allocation3 + $0x8] sm:$0xff] }
 0x314   :  { %v260_v7 = vadd.f32 %v294_v3, %v251_v6  ;;  %v263_v8 = vadd.f32 %v259_v5, %v414_v0 }
 0x316   :  { %v264_v9 = vadd.f32 %v260_v7, %v419_v1  ;;  %265 = vst.msk [vmem:[#allocation3] sm:$0xff] %vm34_vm0, %v263_v8 }
 0x318   :  { %266 = vst.msk [vmem:[#allocation3 + $0x8] sm:$0xff] %vm34_vm0, %v264_v9 }
 0x319   :  { %353 = shalt.err (!%p350_p4)
}
 0x31a   :  { %s354_s23 = scalar_lea.hbm %s488_s7, 256 }
 0x31b   :  { %p355_p5 = scmp.ne.s32.totalorder %s488_s7, %s354_s23  ;;  %p358_p6 = scmp.lt.u32.totalorder %s354_s23, %s488_s7 }
 0x31d   :  { %p360_p7 = pnand %p358_p6, %p355_p5 }
 0x31f   :  { %363 = shalt.err (!%p360_p7)
}
 0x320   :  { %s369_s0 = smov 128   ;;  %s370_s28 = smov 8  }
 0x321   :  { %278 = dma.vmem_to_hbm [thread:$0]  %s273_s20, 256, %s488_s7, [#allocation4], %s369_s0, %s369_s0, %s370_s28  }
 0x322   :  { %364 = dma.done.wait [#allocation4], 256  }
 0x323   :  { %365 = vsyncadd [#allocation4], 4294967040 }
 0x324   :  { %282 = vsyncpa [#allocation4], 1 }

</bundles_post_ra>
